<compile_context>
chip_gen: v5e
topology: v5e:2x2
jax: 0.10.0
libtpu: 0.0.40
codegen_flags: <defaults>
</compile_context>

<pallas_src>
import numpy as np
import jax
import jax.numpy as jnp
from jax import lax
from jax.experimental import pallas as pl
from jax.experimental.pallas import tpu as pltpu


def _blur_taps_1d(filt_size):
    table = {
        1: [1.0],
        2: [1.0, 1.0],
        3: [1.0, 2.0, 1.0],
        4: [1.0, 3.0, 3.0, 1.0],
        5: [1.0, 4.0, 6.0, 4.0, 1.0],
        6: [1.0, 5.0, 10.0, 10.0, 5.0, 1.0],
        7: [1.0, 6.0, 15.0, 20.0, 15.0, 6.0, 1.0],
    }
    a = np.array(table[filt_size], dtype=np.float64)
    # outer(a, a) / sum(outer(a, a)) == outer(a/sum(a), a/sum(a)) exactly.
    return (a / a.sum()).astype(np.float32)


def _conv_matrix(size_in, taps_1d, stride, pad_l, pad_r):
    """M (size_out, size_in): (M @ v) == 1-D zero-padded strided conv of v."""
    filt = len(taps_1d)
    size_out = (size_in + pad_l + pad_r - filt) // stride + 1
    M = np.zeros((size_out, size_in), dtype=np.float32)
    for o in range(size_out):
        for t in range(filt):
            r = o * stride + t - pad_l
            if 0 <= r < size_in:
                M[o, r] = taps_1d[t]
    return M, size_out


def _make_kernel(cblk, H, W, Hout, Wout):
    def kernel(a_ref, bt_ref, x_ref, o_ref):
        cdt = x_ref.dtype
        x = x_ref[...]                                              # (cblk, H, W)

        # Pass 1: blur + stride along W.  Batched MXU matmul; contraction is the
        # lane (minor) dim of x and the sublane dim of Bt -> no relayouts.
        bt_b = jnp.broadcast_to(bt_ref[...], (cblk, W, Wout))
        t = lax.dot_general(x, bt_b, (((2,), (1,)), ((0,), (0,))),
                            preferred_element_type=jnp.float32)     # (cblk, H, Wout)

        # Pass 2: blur + stride along H.  Batched over channels so the result is
        # produced directly in (cblk, Hout, Wout) order -> no output transpose.
        a_b = jnp.broadcast_to(a_ref[...], (cblk, Hout, H))
        y = lax.dot_general(a_b, t.astype(cdt), (((2,), (1,)), ((0,), (0,))),
                            preferred_element_type=jnp.float32)     # (cblk, Hout, Wout)

        o_ref[...] = y.astype(o_ref.dtype)

    return kernel


def blur_pool(x, filt_size=3, stride=2):
    N, C, H, W = x.shape
    taps = _blur_taps_1d(filt_size)
    pad_l = int(1.0 * (filt_size - 1) / 2)
    pad_r = int(np.ceil(1.0 * (filt_size - 1) / 2))

    A_np, Hout = _conv_matrix(H, taps, stride, pad_l, pad_r)   # (Hout, H)
    B_np, Wout = _conv_matrix(W, taps, stride, pad_l, pad_r)   # (Wout, W)
    Bt_np = np.ascontiguousarray(B_np.T)                        # (W, Wout)

    A = jnp.asarray(A_np, dtype=x.dtype)
    Bt = jnp.asarray(Bt_np, dtype=x.dtype)

    itemsize = jnp.dtype(x.dtype).itemsize

    # Generation-aware VMEM budget (v7x: 64 MiB physical; v5e/v6e: 128 MiB).
    try:
        phys_vmem = int(pltpu.get_tpu_info().vmem_capacity_bytes)
        if phys_vmem <= 0:
            raise ValueError
    except Exception:
        phys_vmem = 64 << 20  # conservative fallback (v7x)
    budget = (phys_vmem * 3) // 4  # leave headroom for compiler-internal scratch

    def footprint(cb):
        io = 2 * cb * (H * W + Hout * Wout) * itemsize            # double-buffered in/out
        consts = 2 * (Hout * H + W * Wout) * itemsize             # A / Bt blocks
        interm = cb * (H * Wout * (4 + itemsize)                  # t (f32) + t cast
                       + Hout * H * itemsize                      # broadcast(A)
                       + W * Wout * itemsize                      # broadcast(Bt)
                       + Hout * Wout * 4)                         # y before store
        loaded = cb * H * W * itemsize                            # x materialized
        return io + consts + interm + loaded + (2 << 20)          # + slack

    divs = sorted([d for d in range(1, C + 1) if C % d == 0], reverse=True)
    cblk = next((d for d in divs if footprint(d) <= budget), 1)

    # Megacore (v7x): ensure >= 2 parallel grid steps when the channel count allows.
    if N * (C // cblk) < 2:
        smaller = [d for d in divs if d < cblk]
        if smaller:
            cblk = smaller[0]

    vmem_need = footprint(cblk)
    cp = {"dimension_semantics": ("parallel", "parallel")}
    if vmem_need > (16 << 20):  # v5e default scoped VMEM limit is 16 MiB
        cp["vmem_limit_bytes"] = int(min(max(vmem_need, 32 << 20), budget))

    kernel = _make_kernel(cblk, H, W, Hout, Wout)

    return pl.pallas_call(
        kernel,
        out_shape=jax.ShapeDtypeStruct((N, C, Hout, Wout), x.dtype),
        grid_spec=pltpu.PrefetchScalarGridSpec(
            num_scalar_prefetch=0,
            grid=(N, C // cblk),
            in_specs=[
                pl.BlockSpec((Hout, H), lambda n, c: (0, 0)),
                pl.BlockSpec((W, Wout), lambda n, c: (0, 0)),
                pl.BlockSpec((None, cblk, H, W), lambda n, c: (n, c, 0, 0)),
            ],
            out_specs=pl.BlockSpec((None, cblk, Hout, Wout),
                                   lambda n, c: (n, c, 0, 0)),
        ),
        compiler_params=pltpu.CompilerParams(**cp),
    )(A, Bt, x)


def _reference(x, filt_size=3, stride=2):
    """Zero-pad + strided depthwise conv (== F.pad + F.conv2d(groups=C))."""
    N, C, H, W = x.shape
    a1 = _blur_taps_1d(filt_size)
    k2d = (a1[:, None] * a1[None, :]).astype(np.float32)
    w = jnp.asarray(np.tile(k2d[None, None], (C, 1, 1, 1)), dtype=jnp.float32)
    pad_l = int(1.0 * (filt_size - 1) / 2)
    pad_r = int(np.ceil(1.0 * (filt_size - 1) / 2))
    xp = jnp.pad(x.astype(jnp.float32),
                 ((0, 0), (0, 0), (pad_l, pad_r), (pad_l, pad_r)))
    return lax.conv_general_dilated(
        xp, w, window_strides=(stride, stride), padding="VALID",
        dimension_numbers=("NCHW", "OIHW", "NCHW"), feature_group_count=C)


if __name__ == "__main__":
    key = jax.random.PRNGKey(0)
    k1, k2 = jax.random.split(key)

    # Primary check: small canonical config.
    x1 = jax.random.normal(k1, (2, 4, 16, 16), dtype=jnp.float32)
    y1 = jax.block_until_ready(blur_pool(x1, filt_size=3, stride=2))
    ref1 = _reference(x1, filt_size=3, stride=2)
    assert y1.shape == ref1.shape == (2, 4, 8, 8), (y1.shape, ref1.shape)
    np.testing.assert_allclose(np.asarray(y1), np.asarray(ref1),
                               atol=1e-5, rtol=1e-5)

    # Odd spatial dims + channel count forcing a non-trivial channel split.
    x2 = jax.random.normal(k2, (1, 6, 15, 13), dtype=jnp.float32)
    y2 = jax.block_until_ready(blur_pool(x2, filt_size=3, stride=2))
    ref2 = _reference(x2, filt_size=3, stride=2)
    assert y2.shape == ref2.shape == (1, 6, 8, 7), (y2.shape, ref2.shape)
    np.testing.assert_allclose(np.asarray(y2), np.asarray(ref2),
                               atol=1e-5, rtol=1e-5)

    print("KERNEL_OK")
</pallas_src>

<mosaic_0001>
module attributes {stable_mosaic.version = 11 : i64} {
  func.func @kernel(%arg0: i32, %arg1: i32, %arg2: memref<8x16xf32, #tpu.memory_space<vmem>>, %arg3: memref<16x8xf32, #tpu.memory_space<vmem>>, %arg4: memref<1x4x16x16xf32, #tpu.memory_space<vmem>>, %arg5: memref<1x4x8x8xf32, #tpu.memory_space<vmem>>) attributes {dimension_semantics = [#tpu.dimension_semantics<parallel>, #tpu.dimension_semantics<parallel>], iteration_bounds = array<i64: 2, 1>, scalar_prefetch = 0 : i64, scratch_operands = 0 : i64, tpu.core_type = #tpu.core_type<tc>, window_params = [{pipeline_mode = #tpu.pipeline_mode<synchronous>, transform_indices = @transform_0, window_bounds = array<i64: 8, 16>}, {pipeline_mode = #tpu.pipeline_mode<synchronous>, transform_indices = @transform_1, window_bounds = array<i64: 16, 8>}, {transform_indices = @transform_2, window_bounds = array<i64: 1, 4, 16, 16>}, {transform_indices = @transform_3, window_bounds = array<i64: 1, 4, 8, 8>}]} {
    %c0 = arith.constant 0 : index
    %c0_0 = arith.constant 0 : index
    %c0_1 = arith.constant 0 : index
    %c0_2 = arith.constant 0 : index
    %0 = vector.load %arg4[%c0, %c0_0, %c0_1, %c0_2] : memref<1x4x16x16xf32, #tpu.memory_space<vmem>>, vector<1x4x16x16xf32>
    %1 = vector.shape_cast %0 : vector<1x4x16x16xf32> to vector<4x16x16xf32>
    %c0_3 = arith.constant 0 : index
    %c0_4 = arith.constant 0 : index
    %2 = vector.load %arg3[%c0_3, %c0_4] : memref<16x8xf32, #tpu.memory_space<vmem>>, vector<16x8xf32>
    %3 = vector.shape_cast %2 : vector<16x8xf32> to vector<1x16x8xf32>
    %4 = vector.broadcast %3 : vector<1x16x8xf32> to vector<4x16x8xf32>
    %cst = arith.constant dense<0.000000e+00> : vector<4x16x8xf32>
    %5 = tpu.matmul %1, %4, %cst {dimension_numbers = #tpu.dot_dimension_numbers<[2], [1], [1], [2], [0, 0, 0, 1, 1, 2], [0], [0]>} : vector<4x16x16xf32>, vector<4x16x8xf32>, vector<4x16x8xf32> -> vector<4x16x8xf32>
    %c0_5 = arith.constant 0 : index
    %c0_6 = arith.constant 0 : index
    %6 = vector.load %arg2[%c0_5, %c0_6] : memref<8x16xf32, #tpu.memory_space<vmem>>, vector<8x16xf32>
    %7 = vector.shape_cast %6 : vector<8x16xf32> to vector<1x8x16xf32>
    %8 = vector.broadcast %7 : vector<1x8x16xf32> to vector<4x8x16xf32>
    %cst_7 = arith.constant dense<0.000000e+00> : vector<4x8x8xf32>
    %9 = tpu.matmul %8, %5, %cst_7 {dimension_numbers = #tpu.dot_dimension_numbers<[2], [1], [1], [2], [0, 0, 0, 1, 1, 2], [0], [0]>} : vector<4x8x16xf32>, vector<4x16x8xf32>, vector<4x8x8xf32> -> vector<4x8x8xf32>
    %c0_8 = arith.constant 0 : index
    %c0_9 = arith.constant 0 : index
    %c0_10 = arith.constant 0 : index
    %c0_11 = arith.constant 0 : index
    %10 = vector.load %arg5[%c0_8, %c0_9, %c0_10, %c0_11] : memref<1x4x8x8xf32, #tpu.memory_space<vmem>>, vector<1x4x8x8xf32>
    %11 = vector.shape_cast %10 : vector<1x4x8x8xf32> to vector<4x8x8xf32>
    %12 = vector.shape_cast %9 : vector<4x8x8xf32> to vector<1x4x8x8xf32>
    tpu.vector_store %arg5[%c0_8, %c0_9, %c0_10, %c0_11], %12 {strides = array<i32>} : memref<1x4x8x8xf32, #tpu.memory_space<vmem>>, vector<1x4x8x8xf32>,
    return
  }
  func.func @transform_0(%arg0: i32, %arg1: i32) -> (i32, i32) {
    %c0_i32 = arith.constant 0 : i32
    %c0_i32_0 = arith.constant 0 : i32
    %c0_i32_1 = arith.constant 0 : i32
    return %c0_i32, %c0_i32_0 : i32, i32
  }
  func.func @transform_1(%arg0: i32, %arg1: i32) -> (i32, i32) {
    %c0_i32 = arith.constant 0 : i32
    %c0_i32_0 = arith.constant 0 : i32
    %c0_i32_1 = arith.constant 0 : i32
    return %c0_i32, %c0_i32_0 : i32, i32
  }
  func.func @transform_2(%arg0: i32, %arg1: i32) -> (i32, i32, i32, i32) {
    %c0_i32 = arith.constant 0 : i32
    %c0_i32_0 = arith.constant 0 : i32
    %c0_i32_1 = arith.constant 0 : i32
    return %arg0, %arg1, %c0_i32, %c0_i32_0 : i32, i32, i32, i32
  }
  func.func @transform_3(%arg0: i32, %arg1: i32) -> (i32, i32, i32, i32) {
    %c0_i32 = arith.constant 0 : i32
    %c0_i32_0 = arith.constant 0 : i32
    %c0_i32_1 = arith.constant 0 : i32
    return %arg0, %arg1, %c0_i32, %c0_i32_0 : i32, i32, i32, i32
  }
}

</mosaic_0001>

<bundles_post_ra>
// kernel: tpu_custom_call.1
= control target key start
LH: loop header
LB: loop body
LE: loop exit
PB: predicated region body
PF: predicated region fallthrough
CT: control target
= control target key end

     0   :  { %8 = vsyncpa [#allocation3], 0  ;;  %s908_s0 = inlined_call_operand.vmem [shape: f32[8,16], index: 0, kind: input, shape index: {}]   ;;  %s909_s1 = inlined_call_operand.vmem [shape: f32[16,8], index: 1, kind: input, shape index: {}]   ;;  %s910_s2 = inlined_call_operand.hbm [shape: f32[2,4,16,16], index: 2, kind: input, shape index: {}]   ;;  %s911_s3 = inlined_call_operand.hbm [shape: f32[2,4,8,8], index: 3, kind: output, shape index: {}]  }
   0x1   :  { %10 = vsyncpa [#allocation3 + $0x1], 0 }
   0x2   :  { %11 = vsyncpa [#allocation4], 0 }
   0x3   :  { %13 = vsyncpa [#allocation4 + $0x1], 0  ;;  %s766_s12 = smov 0   ;;  %s768_s13 = smov 0  }
   0x4   :  { %s770_s14 = smov 0   ;;  %s772_s15 = smov 0  }
   0x5   :  { %s774_s16 = smov 0   ;;  %s776_s17 = smov 0  }
   0x6 LB: > { %s533_s18 = sadd.s32 4294967295, %s740_s17   ;;  %s534_s19 = sadd.s32 4294967294, %s740_s17   ;;  %s740_s17 = sphi %s776_s17, %s19_s17   ;;  %s736_s16 = sphi %s774_s16, %s920_s16   ;;  %s732_s15 = sphi %s772_s15, %s919_s15   ;;  %s728_s14 = sphi %s770_s14, %s918_s14   ;;  %s724_s13 = sphi %s768_s13, %s917_s13   ;;  %s720_s12 = sphi %s766_s12, %s916_s12  }
   0x7   : > { %s31_s20 = sadd.s32 1, %s736_s16  ;;  %s82_s21 = sadd.s32 1, %s728_s14 }
   0x8   : > { %p33_p0 = scmp.ge.s32.totalorder %s31_s20, 2  ;;  %p89_p1 = scmp.ne.s32.totalorder %s728_s14, %s724_s13 }
   0x9   : > { %p90_p2 = scmp.eq.s32.totalorder %s740_s17, 0  ;;  %p95_p3 = scmp.ne.s32.totalorder %s724_s13, %s720_s12 }
   0xa   : > { %s922_s20 = smov (%p33_p0, %s31_s20), 0  ;;  %p96_p5 = scmp.eq.s32.totalorder %s533_s18, 0 }
   0xb   : > { %p807_p4 = por %p90_p2, %p89_p1  ;;  %s77_s23 = ssub.s32 %s736_s16, %s922_s20 }
   0xc   : > { %p121_p6 = scmp.eq.s32.totalorder %s533_s18, 1  ;;  %p80_p7 = scmp.eq.s32.totalorder %s77_s23, 0 }
   0xd   : > { %p813_p8 = por %p96_p5, %p95_p3  ;;  %p127_p10 = scmp.eq.s32.totalorder %s534_s19, 1 }
   0xe   : > { %p817_p9 = por %p121_p6, %p89_p1  ;;  %p536_p12 = scmp.ge.s32.totalorder %s740_s17, 2 }
   0xf   : > { %s822_s26 = scalar_select %p80_p7, %s728_s14, %s82_s21  }
  0x10   : > { %p824_p11 = por %p127_p10, %p95_p3  ;;  %p574_p13 = scmp.lt.s32.totalorder %s740_s17, 2 }
  0x11   : > { %s153_s28 = sand.u32 1, %s728_s14   ;;  %s560_s30 = sshll.u32 %s736_s16, 6 }
  0x12   : > { %s537_s29 = sshll.u32 %s153_s28, 6  ;;  %s165_s6 = scalar_lea.hbm %s910_s2, %s560_s30 }
  0x13   : > { %s157_s7 = scalar_lea.vmem [#allocation2], %s537_s29  ;;  %s166_s9 = sshll.u32 %s165_s6, 4  ;;  %s167_s9 = int_to_ptr.hbm [resolvable:$true] %s166_s9 }
  0x14   : > { %s168_s8 = sshll.u32 %s157_s7, 4  ;;  %p567_p0 = pnand %p574_p13, %p807_p4  ;;  %s169_s8 = int_to_ptr.vmem [resolvable:$true] %s168_s8 }
  0x15   : > { %p540_p1 = scmp.ge.s32.totalorder %s740_s17, 1  ;;  %s154_s10 = scalar_lea.sflag [#allocation3], %s153_s28 }
  0x16   : > { %s742_s11 = smov 128   ;;  %s743_s18 = smov 8  }
  0x17   : > { %569 = dma.hbm_to_vmem [thread:$0]  (!%p567_p0), %s167_s9, 1024, %s169_s8, %s154_s10, %s742_s11, %s742_s11, %s743_s18  }
  0x18   : > { %p176_p2 = scmp.lt.s32.totalorder %s740_s17, 3 }
  0x1a   : > { %p177_p3 = pnand %p540_p1, %p176_p2 }
  0x1b   : > { %s840_s19 = sand.u32 (!%p177_p3), 1, %s724_s13  }
  0x1c   : > { %180 = sbr.rel (%p177_p3) target bundleno = 318 (0x13e), region = 32  ;;  %s541_s21 = sshll.u32 (!%p177_p3), %s840_s19, 6 }
  0x1d   : > { %s183_s23 = scalar_lea.sflag (!%p177_p3), [#allocation3], %s840_s19  ;;  %s186_s29 = scalar_lea.vmem (!%p177_p3), [#allocation2], %s541_s21 }
  0x21   : > { %711 = dma.done.wait (%p813_p8), %s183_s23, 1024  }
  0x22   : > { %713 = vsyncadd (%p813_p8), %s183_s23, 4294966272  ;;  %v221_v0 = vld [vmem:[%s909_s1 + $0x8] sm:$0xff]  ;;  %v220_v1 = vld [vmem:[%s909_s1] sm:$0xff]  ;;  %vm222_vm0 = vcmask 130048   ;;  %s542_s6 = sshll.u32 %s840_s19, 5  ;;  %vm423_vm1 = vcmask 64512  }
  0x23   : > { %301 = vmatpush.msra.mxu2 %v221_v0  ;;  %330 = vmatpush.msra.mxu3 %v221_v0  ;;  %v216_v2 = vld [vmem:[%s186_s29 + $0x20] sm:$0xff]  ;;  %v218_v3 = vld [vmem:[%s186_s29 + $0x30] sm:$0xff]  ;;  %v217_v6 = vld [vmem:[%s186_s29 + $0x28] sm:$0xff]  ;;  %s561_s7 = sshll.u32 %s732_s15, 5  ;;  %s209_s8 = scalar_lea.vmem [#allocation5], %s542_s6 }
  0x24   : > { %243 = vmatpush.msra.mxu0 %v221_v0  ;;  %272 = vmatpush.msra.mxu1 %v221_v0  ;;  %v212_v4 = vld [vmem:[%s186_s29] sm:$0xff]  ;;  %v214_v5 = vld [vmem:[%s186_s29 + $0x10] sm:$0xff]  ;;  %v219_v7 = vld [vmem:[%s186_s29 + $0x38] sm:$0xff]  ;;  %s442_s11 = scalar_lea.hbm %s911_s3, %s561_s7  ;;  %s443_s18 = sshll.u32 %s209_s8, 4  ;;  %s444_s18 = int_to_ptr.vmem [resolvable:$true] %s443_s18 }
  0x25   : > { %302 = vmatpush.msra.mxu2 %v220_v1  ;;  %331 = vmatpush.msra.mxu3 %v220_v1  ;;  %v213_v8 = vld [vmem:[%s186_s29 + $0x8] sm:$0xff]  ;;  %v215_v9 = vld [vmem:[%s186_s29 + $0x18] sm:$0xff]  ;;  %v339_v16 = vld [vmem:[%s908_s0] sm:$0xff]  ;;  %s445_s21 = sshll.u32 %s442_s11, 4  ;;  %s429_s23 = scalar_lea.sflag [#allocation4], %s840_s19  ;;  %s446_s21 = int_to_ptr.hbm [resolvable:$true] %s445_s21 }
  0x26   : > { %547 = vmatmul.msk.f32.vlgmr.msra.gmra.mxu2 %vm222_vm0, %v216_v2  ;;  %549 = vmatmul.msk.f32.vlgmr.msra.gmra.mxu3 %vm222_vm0, %v218_v3  ;;  %s672_s29 = sshra.s32 %s446_s21, 4  ;;  %s678_s30 = scalar_lea.hbm %s911_s3, 64  ;;  %s673_s29 = int_to_ptr.hbm [resolvable:$true] %s672_s29 }
  0x27   : > { %244 = vmatpush.msra.mxu0 %v220_v1  ;;  %273 = vmatpush.msra.mxu1 %v220_v1  ;;  %s674_s15 = scalar_lea.hbm %s673_s29, 32  ;;  %p679_p7 = scmp.lt.s32.totalorder %s673_s29, %s911_s3 }
  0x28   : > { %543 = vmatmul.msk.f32.vlgmr.msra.gmra.mxu0 %vm222_vm0, %v212_v4  ;;  %545 = vmatmul.msk.f32.vlgmr.msra.gmra.mxu1 %vm222_vm0, %v214_v5  ;;  %p675_p4 = scmp.ne.s32.totalorder %s673_s29, %s674_s15  ;;  %p680_p8 = scmp.lt.s32.totalorder %s678_s30, %s674_s15 }
  0x2a   : > { %p676_p5 = pnand %p675_p4, %p817_p9  ;;  %p681_p10 = por %p680_p8, %p679_p7 }
  0x2c   : > { %p677_p6 = pneg %p676_p5 }
  0x2e   : > { %548 = vmatmul.msk.f32.gmra.mxu2 %vm222_vm0, %v217_v6  ;;  %550 = vmatmul.msk.f32.gmra.mxu3 %vm222_vm0, %v219_v7  ;;  %p682_p13 = pnand %p681_p10, %p677_p6 }
  0x30   : > { %544 = vmatmul.msk.f32.gmra.mxu0 %vm222_vm0, %v213_v8  ;;  %546 = vmatmul.msk.f32.gmra.mxu1 %vm222_vm0, %v215_v9 }
  0xa5   : > { %v246_v10 = vpop.f32.mrf.mxu0  ;;  %v275_v11 = vpop.f32.mrf.mxu1 }
  0xa9   : > { %v304_v12 = vpop.f32.mrf.mxu2  ;;  %v333_v13 = vpop.f32.mrf.mxu3 }
  0xad   : > { %v249_v14 = vpop.f32.mrf.mxu0  ;;  %v278_v15 = vpop.f32.mrf.mxu1 }
  0xae   : > { %357 = vmatpush.msrb.mxu0 %v249_v14  ;;  %377 = vmatpush.msrb.mxu1 %v278_v15 }
  0xb0   : > { %358 = vmatpush.msrb.mxu0 %v246_v10  ;;  %378 = vmatpush.msrb.mxu1 %v275_v11 }
  0xb1   : > { %v307_v17 = vpop.f32.mrf.mxu2  ;;  %v336_v18 = vpop.f32.mrf.mxu3  ;;  %551 = vmatmul.msk.f32.vlgmr.msrb.gmra.mxu0 %vm222_vm0, %v339_v16  ;;  %552 = vmatmul.msk.f32.vlgmr.msrb.gmra.mxu1 %vm222_vm0, %v339_v16 }
  0xb2   : > { %397 = vmatpush.msrb.mxu2 %v307_v17  ;;  %417 = vmatpush.msrb.mxu3 %v336_v18 }
  0xb4   : > { %398 = vmatpush.msrb.mxu2 %v304_v12  ;;  %418 = vmatpush.msrb.mxu3 %v333_v13 }
  0xb5   : > { %553 = vmatmul.msk.f32.vlgmr.msrb.gmra.mxu2 %vm222_vm0, %v339_v16  ;;  %554 = vmatmul.msk.f32.vlgmr.msrb.gmra.mxu3 %vm222_vm0, %v339_v16 }
 0x12e   : > { %v360_v19 = vpop.f32.mrf.mxu0  ;;  %v380_v20 = vpop.f32.mrf.mxu1 }
 0x12f   : > { %424 = vst.msk [vmem:[%s209_s8] sm:$0xff] %vm423_vm1, %v360_v19 }
 0x130   : > { %425 = vst.msk [vmem:[%s209_s8 + $0x8] sm:$0xff] %vm423_vm1, %v380_v20 }
 0x138   : > { %v400_v21 = vpop.f32.mrf.mxu2  ;;  %v420_v22 = vpop.f32.mrf.mxu3 }
 0x139   : > { %426 = vst.msk [vmem:[%s209_s8 + $0x10] sm:$0xff] %vm423_vm1, %v400_v21 }
 0x13a   : > { %427 = vst.msk [vmem:[%s209_s8 + $0x18] sm:$0xff] %vm423_vm1, %v420_v22 }
 0x13b   : > { %685 = shalt.err (!%p682_p13)
}
 0x13c   : > { %s744_s19 = smov 128   ;;  %s745_s5 = smov 8  }
 0x13d   : > { %564 = dma.vmem_to_hbm [thread:$0]  (%p817_p9), %s444_s18, 512, %s446_s21, %s429_s23, %s744_s19, %s744_s19, %s745_s5  }
 0x13e PF: > { %s460_s6 = sand.u32 1, %s720_s12   ;;  %p571_p0 = pnand %p536_p12, %p824_p11 }
 0x13f   : > { %s461_s7 = scalar_lea.sflag [#allocation4], %s460_s6 }
 0x140   : > { %p572_p1 = pneg %p571_p0 }
 0x142   : > { %715 = dma.done.wait (%p572_p1), %s461_s7, 512  }
 0x143   : > { %717 = vsyncadd (%p572_p1), %s461_s7, 4294966784  ;;  %s19_s17 = sadd.s32 1, %s740_s17   ;;  %s916_s12 = smov %s724_s13 }
 0x144   : > { %p16_p2 = scmp.ge.s32.totalorder %s19_s17, 4   ;;  %s917_s13 = smov %s728_s14 }
 0x145   : > { %s918_s14 = smov %s822_s26  ;;  %s919_s15 = smov %s736_s16 }
 0x146   : > { %s920_s16 = smov %s922_s20  ;;  %18 = sbr.rel (!%p16_p2) target bundleno = 6 (0x6), region = 77 }
 0x14b   :  { %467 = vsyncpa [#allocation3], 1 }
 0x14c   :  { %469 = vsyncpa [#allocation3 + $0x1], 1 }
 0x14d   :  { %470 = vsyncpa [#allocation4], 1 }
 0x14e   :  { %472 = vsyncpa [#allocation4 + $0x1], 1 }

</bundles_post_ra>
